<compile_context>
chip_gen: v7x
topology: tpu7x:2x2x1
jax: 0.10.0
libtpu: 0.0.40
codegen_flags: <defaults>
</compile_context>

<pallas_src>
import jax
import jax.numpy as jnp
from jax.experimental import pallas as pl
from jax.experimental.pallas import tpu as pltpu


VMEM_BUDGET = 44 * 1024 * 1024   # tiling budget: safe under v7x's 64 MiB physical VMEM
VMEM_LIMIT = 48 * 1024 * 1024    # scoped VMEM limit handed to Mosaic (ok on v5e/v6e/v7x)


def _cdiv(a, b):
    return -(-a // b)


def _round_up(x, m):
    return _cdiv(x, m) * m


# --------------------------------------------------------------------------- #
# Kernels
# --------------------------------------------------------------------------- #
def _fm_fused_kernel(uftab_ref, iftab_ref, ubcol_ref, ibcol_ref, uid_ref, iid_ref,
                     gb_ref, pred_ref, cvr_ref):
    """Fused gather + score.

    uftab_ref/iftab_ref: (E, NU)/(E, NI) VMEM-resident factor tables (f32 or bf16).
    ubcol_ref/ibcol_ref: (NU, 1)/(NI, 1) f32 VMEM-resident bias columns.
    uid_ref/iid_ref:     (1, TB) int32 id tiles (batch on the lane axis).
    gb_ref:              (1,) f32 global bias in SMEM.
    pred_ref/cvr_ref:    (1, TB) f32 lane-dense outputs.
    """
    nu = uftab_ref.shape[1]
    ni = iftab_ref.shape[1]
    tb = uid_ref.shape[1]

    uid = uid_ref[...]                                               # (1, TB) i32
    iid = iid_ref[...]

    # One-hot selection matrices built on the VPU, consumed by the (idle) MXU.
    u_oh = (jax.lax.broadcasted_iota(jnp.int32, (nu, tb), 0) == uid).astype(jnp.float32)
    i_oh = (jax.lax.broadcasted_iota(jnp.int32, (ni, tb), 0) == iid).astype(jnp.float32)

    # Exact gathers: table (E, N) @ one_hot (N, TB) -> (E, TB), f32 accumulate.
    uf = jnp.dot(uftab_ref[...].astype(jnp.float32), u_oh,
                 preferred_element_type=jnp.float32)
    itf = jnp.dot(iftab_ref[...].astype(jnp.float32), i_oh,
                  preferred_element_type=jnp.float32)

    dot_ui = jnp.sum(uf * itf, axis=0, keepdims=True)                # (1, TB)

    # Bias gathers via broadcast-multiply + sublane reduce (exact, f32).
    ubias = jnp.sum(ubcol_ref[...] * u_oh, axis=0, keepdims=True)    # (1, TB)
    ibias = jnp.sum(ibcol_ref[...] * i_oh, axis=0, keepdims=True)    # (1, TB)

    pred = dot_ui + ubias + ibias + gb_ref[0]
    pred_ref[...] = pred
    cvr_ref[...] = jax.nn.sigmoid(pred)


def _fm_gathered_kernel(uf_ref, if_ref, ub_ref, ib_ref, gb_ref, pred_ref, cvr_ref):
    """Score pre-gathered features.

    uf_ref/if_ref: (E, TB) feature tiles (f32 or bf16; batch on lanes).
    ub_ref/ib_ref/pred_ref/cvr_ref: (1, TB) lane-dense rows. gb_ref: (1,) SMEM.
    """
    uf = uf_ref[...].astype(jnp.float32)      # upcast right after load (v5e-safe)
    itf = if_ref[...].astype(jnp.float32)
    s = jnp.sum(uf * itf, axis=0, keepdims=True)
    pred = s + ub_ref[...] + ib_ref[...] + gb_ref[0]
    pred_ref[...] = pred
    cvr_ref[...] = jax.nn.sigmoid(pred)


# --------------------------------------------------------------------------- #
# pallas_call wrappers
# --------------------------------------------------------------------------- #
def _fm_fused_pallas(uftab, iftab, ubcol, ibcol, gbias, uid2d, iid2d, TB):
    E, NU = uftab.shape
    _, NI = iftab.shape
    Bp = uid2d.shape[1]
    assert Bp % TB == 0 and TB % 128 == 0

    resident = lambda i: (0, 0)                       # DMA'd once, stays VMEM-resident
    tile_row = pl.BlockSpec((1, TB), lambda i: (0, i))

    return pl.pallas_call(
        _fm_fused_kernel,
        out_shape=(
            jax.ShapeDtypeStruct((1, Bp), jnp.float32),
            jax.ShapeDtypeStruct((1, Bp), jnp.float32),
        ),
        grid=(Bp // TB,),
        in_specs=[
            pl.BlockSpec((E, NU), resident),                      # user factor table
            pl.BlockSpec((E, NI), resident),                      # item factor table
            pl.BlockSpec((NU, 1), resident),                      # user bias column
            pl.BlockSpec((NI, 1), resident),                      # item bias column
            tile_row,                                             # uid (1, TB) int32
            tile_row,                                             # iid (1, TB) int32
            pl.BlockSpec(memory_space=pltpu.MemorySpace.SMEM),    # global bias (1,)
        ],
        out_specs=(tile_row, tile_row),
        compiler_params=pltpu.CompilerParams(
            dimension_semantics=("parallel",),        # independent batch tiles
            vmem_limit_bytes=VMEM_LIMIT,
        ),
    )(uftab, iftab, ubcol, ibcol, uid2d, iid2d, gbias)


def _fm_gathered_pallas(uf_t, if_t, ub_row, ib_row, gbias, TB):
    E, Bp = uf_t.shape
    assert Bp % TB == 0 and TB % 128 == 0

    feat_spec = pl.BlockSpec((E, TB), lambda i: (0, i))
    row_spec = pl.BlockSpec((1, TB), lambda i: (0, i))

    return pl.pallas_call(
        _fm_gathered_kernel,
        out_shape=(
            jax.ShapeDtypeStruct((1, Bp), jnp.float32),
            jax.ShapeDtypeStruct((1, Bp), jnp.float32),
        ),
        grid=(Bp // TB,),
        in_specs=[
            feat_spec,                                            # user features (E, TB)
            feat_spec,                                            # item features (E, TB)
            row_spec,                                             # user bias   (1, TB)
            row_spec,                                             # item bias   (1, TB)
            pl.BlockSpec(memory_space=pltpu.MemorySpace.SMEM),    # global bias (1,)
        ],
        out_specs=(row_spec, row_spec),
        compiler_params=pltpu.CompilerParams(
            dimension_semantics=("parallel",),
            vmem_limit_bytes=VMEM_LIMIT,
        ),
    )(uf_t, if_t, ub_row, ib_row, gbias)


# --------------------------------------------------------------------------- #
# Tiling / forward wrapper
# --------------------------------------------------------------------------- #
def _pick_batch_tiling(B, E, NU, NI, itemsize, fused, batch_tile_max=None):
    """E-aware batch tile: big enough to amortize per-step overhead, small enough
    to keep the double-buffered footprint under VMEM_BUDGET (v7x-safe), and with
    per-tile padding < ~128 lanes."""
    if batch_tile_max is None:
        if fused:
            # Per-lane VMEM that scales with TB: f32 one-hots + f32 feature
            # intermediates + double-buffered id/output rows.
            per_lane = 4 * (NU + NI) + 4 * 4 * max(E, 8) + 16 * 4
        else:
            per_lane = 2 * 2 * E * itemsize + 2 * 4 * E + 16 * 4
        cap = VMEM_BUDGET // per_lane
        if not fused:
            # Also target ~4 MiB of gathered-feature DMA per grid step.
            cap = min(cap, (4 * 1024 * 1024) // max(2 * E * itemsize, 1))
        batch_tile_max = min(16384, max(128, cap))
    batch_tile_max = max(128, (batch_tile_max // 128) * 128)

    n_tiles = _cdiv(B, batch_tile_max)
    if B > 256:
        n_tiles = max(n_tiles, 2)         # >=2 tiles so "parallel" spans both v7x TCs
    TB = _round_up(_cdiv(B, n_tiles), 128)
    Bp = TB * n_tiles
    assert TB % 128 == 0 and Bp >= B
    return TB, Bp


def make_drfm_forward(params, *, table_dtype=jnp.float32, force_path=None,
                      batch_tile_max=None):
    """Returns a jitted forward(user_id, item_id) -> (pred, cvr).

    One-time layout prep (done here, NOT per call): tables stored pre-transposed
    as (E, N) and optionally cast to bf16; biases kept in f32.
    """
    tdt = jnp.dtype(table_dtype)
    uftab = jnp.asarray(params["user_factors"]).T.astype(tdt)   # (E, NU)
    iftab = jnp.asarray(params["item_factors"]).T.astype(tdt)   # (E, NI)
    ub = jnp.asarray(params["user_bias"], jnp.float32)          # (NU,)
    ib = jnp.asarray(params["item_bias"], jnp.float32)          # (NI,)
    gb = jnp.asarray(params["global_bias"], jnp.float32).reshape(1)
    E, NU = uftab.shape
    _, NI = iftab.shape
    itemsize = tdt.itemsize

    if force_path is None:
        # Fused path when the tables (+ per-lane one-hot work) are small enough
        # to keep VMEM-resident; otherwise XLA gather from pre-transposed tables.
        fused = (NU + NI) <= 2048 and E * (NU + NI) * itemsize <= 4 * 1024 * 1024
    else:
        fused = (force_path == "fused")

    def forward(user_id, item_id):
        B = user_id.shape[0]
        TB, Bp = _pick_batch_tiling(B, E, NU, NI, itemsize, fused, batch_tile_max)
        pad = Bp - B
        # Padded ids are 0 (a valid row) -> in-kernel gather never goes OOB;
        # padded lanes are sliced off before returning.
        uid = jnp.pad(user_id.astype(jnp.int32), (0, pad))
        iid = jnp.pad(item_id.astype(jnp.int32), (0, pad))

        if fused:
            pred2d, cvr2d = _fm_fused_pallas(
                uftab, iftab, ub.reshape(NU, 1), ib.reshape(NI, 1), gb,
                uid.reshape(1, Bp), iid.reshape(1, Bp), TB)
        else:
            # Gather straight into the (E, Bp) kernel layout (no transpose pass).
            uf_t = jnp.take(uftab, uid, axis=1)                  # (E, Bp)
            if_t = jnp.take(iftab, iid, axis=1)                  # (E, Bp)
            ub_row = jnp.take(ub, uid).reshape(1, Bp)
            ib_row = jnp.take(ib, iid).reshape(1, Bp)
            pred2d, cvr2d = _fm_gathered_pallas(uf_t, if_t, ub_row, ib_row, gb, TB)

        return pred2d[0, :B], cvr2d[0, :B]

    return jax.jit(forward)


def init_params(key, num_users, num_items, embedding_size):
    k = jax.random.split(key, 5)
    return {
        # Embedding.weight.data.normal_(std=0.3)
        "user_factors": 0.3 * jax.random.normal(k[0], (num_users, embedding_size), jnp.float32),
        "item_factors": 0.3 * jax.random.normal(k[1], (num_items, embedding_size), jnp.float32),
        # torch.randn biases
        "user_bias": jax.random.normal(k[2], (num_users,), jnp.float32),
        "item_bias": jax.random.normal(k[3], (num_items,), jnp.float32),
        "global_bias": jax.random.normal(k[4], (1,), jnp.float32),
    }


if __name__ == "__main__":
    num_users, num_items, embedding_size = 32, 48, 32
    batch = 8

    key = jax.random.PRNGKey(0)
    pkey, ukey, ikey = jax.random.split(key, 3)
    params = init_params(pkey, num_users, num_items, embedding_size)

    user_id = jax.random.randint(ukey, (batch,), 0, num_users, dtype=jnp.int32)
    item_id = jax.random.randint(ikey, (batch,), 0, num_items, dtype=jnp.int32)

    # Pure-JAX f32 reference of the forward semantics.
    uf = params["user_factors"][user_id]
    itf = params["item_factors"][item_id]
    ref_pred = (uf * itf).sum(axis=1) + params["user_bias"][user_id] \
        + params["item_bias"][item_id] + params["global_bias"]
    ref_cvr = jax.nn.sigmoid(ref_pred)

    # 1) Fused in-kernel gather path (default for small vocabs), f32 tables.
    fwd_fused = make_drfm_forward(params, force_path="fused")
    pred, cvr = jax.block_until_ready(fwd_fused(user_id, item_id))
    assert jnp.allclose(pred, ref_pred, atol=1e-5), "fused pred mismatch"
    assert jnp.allclose(cvr, ref_cvr, atol=1e-5), "fused cvr mismatch"

    # 2) Fallback path (pre-transposed table gather, no transpose round-trip).
    fwd_gathered = make_drfm_forward(params, force_path="gathered")
    pred_g, cvr_g = jax.block_until_ready(fwd_gathered(user_id, item_id))
    assert jnp.allclose(pred_g, ref_pred, atol=1e-5), "gathered pred mismatch"
    assert jnp.allclose(cvr_g, ref_cvr, atol=1e-5), "gathered cvr mismatch"

    # 3) bf16-stored factor tables, f32 accumulate in-kernel (memory-BW saver).
    fwd_bf16 = make_drfm_forward(params, table_dtype=jnp.bfloat16, force_path="fused")
    pred_b, cvr_b = jax.block_until_ready(fwd_bf16(user_id, item_id))
    uf_b = params["user_factors"].astype(jnp.bfloat16).astype(jnp.float32)[user_id]
    if_b = params["item_factors"].astype(jnp.bfloat16).astype(jnp.float32)[item_id]
    ref_pred_b = (uf_b * if_b).sum(axis=1) + params["user_bias"][user_id] \
        + params["item_bias"][item_id] + params["global_bias"]
    assert jnp.allclose(pred_b, ref_pred_b, atol=1e-4), "bf16 pred mismatch"
    assert jnp.allclose(cvr_b, jax.nn.sigmoid(ref_pred_b), atol=1e-4), "bf16 cvr mismatch"

    print("KERNEL_OK")
</pallas_src>

<mosaic_0001>
module attributes {stable_mosaic.version = 11 : i64} {
  func.func @_fm_fused_kernel(%arg0: i32, %arg1: memref<32x32xf32, #tpu.memory_space<vmem>>, %arg2: memref<32x48xf32, #tpu.memory_space<vmem>>, %arg3: memref<32x1xf32, #tpu.memory_space<vmem>>, %arg4: memref<48x1xf32, #tpu.memory_space<vmem>>, %arg5: memref<1x128xi32, #tpu.memory_space<vmem>>, %arg6: memref<1x128xi32, #tpu.memory_space<vmem>>, %arg7: memref<1xf32, #tpu.memory_space<smem>>, %arg8: memref<1x128xf32, #tpu.memory_space<vmem>>, %arg9: memref<1x128xf32, #tpu.memory_space<vmem>>) attributes {dimension_semantics = [#tpu.dimension_semantics<parallel>], iteration_bounds = array<i64: 1>, scalar_prefetch = 0 : i64, scratch_operands = 0 : i64, tpu.core_type = #tpu.core_type<tc>, window_params = [{pipeline_mode = #tpu.pipeline_mode<synchronous>, transform_indices = @transform_0, window_bounds = array<i64: 32, 32>}, {pipeline_mode = #tpu.pipeline_mode<synchronous>, transform_indices = @transform_1, window_bounds = array<i64: 32, 48>}, {pipeline_mode = #tpu.pipeline_mode<synchronous>, transform_indices = @transform_2, window_bounds = array<i64: 32, 1>}, {pipeline_mode = #tpu.pipeline_mode<synchronous>, transform_indices = @transform_3, window_bounds = array<i64: 48, 1>}, {transform_indices = @transform_4, window_bounds = array<i64: 1, 128>}, {transform_indices = @transform_5, window_bounds = array<i64: 1, 128>}, {transform_indices = @transform_6, window_bounds = array<i64: 1>}, {transform_indices = @transform_7, window_bounds = array<i64: 1, 128>}, {transform_indices = @transform_8, window_bounds = array<i64: 1, 128>}]} {
    %c0 = arith.constant 0 : index
    %c0_0 = arith.constant 0 : index
    %0 = vector.load %arg5[%c0, %c0_0] : memref<1x128xi32, #tpu.memory_space<vmem>>, vector<1x128xi32>
    %c0_1 = arith.constant 0 : index
    %c0_2 = arith.constant 0 : index
    %1 = vector.load %arg6[%c0_1, %c0_2] : memref<1x128xi32, #tpu.memory_space<vmem>>, vector<1x128xi32>
    %2 = tpu.iota {dimensions = array<i32: 0>} : vector<32x128xi32>
    %3 = vector.broadcast %0 : vector<1x128xi32> to vector<32x128xi32>
    %4 = arith.cmpi eq, %2, %3 : vector<32x128xi32>
    %5 = arith.extui %4 : vector<32x128xi1> to vector<32x128xi32>
    %6 = arith.sitofp %5 : vector<32x128xi32> to vector<32x128xf32>
    %7 = tpu.iota {dimensions = array<i32: 0>} : vector<48x128xi32>
    %8 = vector.broadcast %1 : vector<1x128xi32> to vector<48x128xi32>
    %9 = arith.cmpi eq, %7, %8 : vector<48x128xi32>
    %10 = arith.extui %9 : vector<48x128xi1> to vector<48x128xi32>
    %11 = arith.sitofp %10 : vector<48x128xi32> to vector<48x128xf32>
    %c0_3 = arith.constant 0 : index
    %c0_4 = arith.constant 0 : index
    %12 = vector.load %arg1[%c0_3, %c0_4] : memref<32x32xf32, #tpu.memory_space<vmem>>, vector<32x32xf32>
    %cst = arith.constant dense<0.000000e+00> : vector<32x128xf32>
    %13 = tpu.matmul %12, %6, %cst {dimension_numbers = #tpu.dot_dimension_numbers<[1], [0], [0], [1], [0, 0, 1, 1], [], []>} : vector<32x32xf32>, vector<32x128xf32>, vector<32x128xf32> -> vector<32x128xf32>
    %c0_5 = arith.constant 0 : index
    %c0_6 = arith.constant 0 : index
    %14 = vector.load %arg2[%c0_5, %c0_6] : memref<32x48xf32, #tpu.memory_space<vmem>>, vector<32x48xf32>
    %cst_7 = arith.constant dense<0.000000e+00> : vector<32x128xf32>
    %15 = tpu.matmul %14, %11, %cst_7 {dimension_numbers = #tpu.dot_dimension_numbers<[1], [0], [0], [1], [0, 0, 1, 1], [], []>} : vector<32x48xf32>, vector<48x128xf32>, vector<32x128xf32> -> vector<32x128xf32>
    %16 = arith.mulf %13, %15 : vector<32x128xf32>
    %cst_8 = arith.constant dense<0.000000e+00> : vector<128xf32>
    %17 = vector.multi_reduction <add>, %16, %cst_8 [0] : vector<32x128xf32> to vector<128xf32>
    %18 = vector.shape_cast %17 : vector<128xf32> to vector<1x128xf32>
    %c0_9 = arith.constant 0 : index
    %c0_10 = arith.constant 0 : index
    %19 = vector.load %arg3[%c0_9, %c0_10] : memref<32x1xf32, #tpu.memory_space<vmem>>, vector<32x1xf32>
    %20 = vector.broadcast %19 : vector<32x1xf32> to vector<32x128xf32>
    %21 = arith.mulf %20, %6 : vector<32x128xf32>
    %cst_11 = arith.constant dense<0.000000e+00> : vector<128xf32>
    %22 = vector.multi_reduction <add>, %21, %cst_11 [0] : vector<32x128xf32> to vector<128xf32>
    %23 = vector.shape_cast %22 : vector<128xf32> to vector<1x128xf32>
    %c0_12 = arith.constant 0 : index
    %c0_13 = arith.constant 0 : index
    %24 = vector.load %arg4[%c0_12, %c0_13] : memref<48x1xf32, #tpu.memory_space<vmem>>, vector<48x1xf32>
    %25 = vector.broadcast %24 : vector<48x1xf32> to vector<48x128xf32>
    %26 = arith.mulf %25, %11 : vector<48x128xf32>
    %cst_14 = arith.constant dense<0.000000e+00> : vector<128xf32>
    %27 = vector.multi_reduction <add>, %26, %cst_14 [0] : vector<48x128xf32> to vector<128xf32>
    %28 = vector.shape_cast %27 : vector<128xf32> to vector<1x128xf32>
    %29 = arith.addf %18, %23 : vector<1x128xf32>
    %30 = arith.addf %29, %28 : vector<1x128xf32>
    %c0_15 = arith.constant 0 : index
    %31 = memref.load %arg7[%c0_15] : memref<1xf32, #tpu.memory_space<smem>>
    %32 = vector.broadcast %31 : f32 to vector<1x128xf32>
    %33 = arith.addf %30, %32 : vector<1x128xf32>
    %c0_16 = arith.constant 0 : index
    %c0_17 = arith.constant 0 : index
    %34 = vector.load %arg8[%c0_16, %c0_17] : memref<1x128xf32, #tpu.memory_space<vmem>>, vector<1x128xf32>
    tpu.vector_store %arg8[%c0_16, %c0_17], %33 {strides = array<i32>} : memref<1x128xf32, #tpu.memory_space<vmem>>, vector<1x128xf32>,
    %35 = arith.negf %33 : vector<1x128xf32>
    %36 = math.exp %35 : vector<1x128xf32>
    %cst_18 = arith.constant 1.000000e+00 : f32
    %37 = vector.broadcast %cst_18 : f32 to vector<1x128xf32>
    %38 = arith.addf %37, %36 : vector<1x128xf32>
    %39 = arith.divf %37, %38 : vector<1x128xf32>
    %c0_19 = arith.constant 0 : index
    %c0_20 = arith.constant 0 : index
    %40 = vector.load %arg9[%c0_19, %c0_20] : memref<1x128xf32, #tpu.memory_space<vmem>>, vector<1x128xf32>
    tpu.vector_store %arg9[%c0_19, %c0_20], %39 {strides = array<i32>} : memref<1x128xf32, #tpu.memory_space<vmem>>, vector<1x128xf32>,
    return
  }
  func.func @transform_0(%arg0: i32) -> (i32, i32) {
    %c0_i32 = arith.constant 0 : i32
    %c0_i32_0 = arith.constant 0 : i32
    %c0_i32_1 = arith.constant 0 : i32
    return %c0_i32, %c0_i32_0 : i32, i32
  }
  func.func @transform_1(%arg0: i32) -> (i32, i32) {
    %c0_i32 = arith.constant 0 : i32
    %c0_i32_0 = arith.constant 0 : i32
    %c0_i32_1 = arith.constant 0 : i32
    return %c0_i32, %c0_i32_0 : i32, i32
  }
  func.func @transform_2(%arg0: i32) -> (i32, i32) {
    %c0_i32 = arith.constant 0 : i32
    %c0_i32_0 = arith.constant 0 : i32
    %c0_i32_1 = arith.constant 0 : i32
    return %c0_i32, %c0_i32_0 : i32, i32
  }
  func.func @transform_3(%arg0: i32) -> (i32, i32) {
    %c0_i32 = arith.constant 0 : i32
    %c0_i32_0 = arith.constant 0 : i32
    %c0_i32_1 = arith.constant 0 : i32
    return %c0_i32, %c0_i32_0 : i32, i32
  }
  func.func @transform_4(%arg0: i32) -> (i32, i32) {
    %c0_i32 = arith.constant 0 : i32
    %c0_i32_0 = arith.constant 0 : i32
    return %c0_i32, %arg0 : i32, i32
  }
  func.func @transform_5(%arg0: i32) -> (i32, i32) {
    %c0_i32 = arith.constant 0 : i32
    %c0_i32_0 = arith.constant 0 : i32
    return %c0_i32, %arg0 : i32, i32
  }
  func.func @transform_6(%arg0: i32) -> i32 {
    %c0_i32 = arith.constant 0 : i32
    %c0_i32_0 = arith.constant 0 : i32
    return %c0_i32 : i32
  }
  func.func @transform_7(%arg0: i32) -> (i32, i32) {
    %c0_i32 = arith.constant 0 : i32
    %c0_i32_0 = arith.constant 0 : i32
    return %c0_i32, %arg0 : i32, i32
  }
  func.func @transform_8(%arg0: i32) -> (i32, i32) {
    %c0_i32 = arith.constant 0 : i32
    %c0_i32_0 = arith.constant 0 : i32
    return %c0_i32, %arg0 : i32, i32
  }
}

</mosaic_0001>

<bundles_post_ra>
// kernel: forward.1
= control target key start
LH: loop header
LB: loop body
LE: loop exit
PB: predicated region body
PF: predicated region fallthrough
CT: control target
= control target key end

     0   :  { %15 = vsyncpa [#allocation4], 0  ;;  %s924_s0 = inlined_call_operand.hbm [shape: f32[32,32], index: 0, kind: input, shape index: {}]   ;;  %s925_s1 = inlined_call_operand.hbm [shape: f32[32,48], index: 1, kind: input, shape index: {}]   ;;  %s926_s2 = inlined_call_operand.hbm [shape: f32[32,1], index: 2, kind: input, shape index: {}]   ;;  %s927_s3 = inlined_call_operand.hbm [shape: f32[48,1], index: 3, kind: input, shape index: {}]   ;;  %s928_s4 = inlined_call_operand.vmem [shape: s32[1,128], index: 4, kind: input, shape index: {}]   ;;  %s929_s5 = inlined_call_operand.vmem [shape: s32[1,128], index: 5, kind: input, shape index: {}]   ;;  %s930_s6 = inlined_call_operand.<no memory space> [shape: f32[1], index: 6, kind: input, shape index: {}]   ;;  %s931_s7 = inlined_call_operand.vmem [shape: f32[1,128], index: 7, kind: output, shape index: {0}]   ;;  %s932_s8 = inlined_call_operand.vmem [shape: f32[1,128], index: 8, kind: output, shape index: {1}]  }
   0x1   :  { %16 = vsyncpa [#allocation6], 0 }
   0x2   :  { %17 = vsyncpa [#allocation9], 0  ;;  %s672_s27 = smov [#allocation5]   ;;  %s673_s29 = smov [#allocation3]  }
   0x3   :  { %s35_s28 = sshll.u32 %s672_s27, 4  ;;  %s23_s30 = sshll.u32 %s673_s29, 4  ;;  %s36_s28 = int_to_ptr.vmem [resolvable:$true] %s35_s28  ;;  %s726_s30 = int_to_ptr.vmem [resolvable:$true] %s23_s30 }
   0x4   :  { %s578_s11 = scalar_lea.hbm %s925_s1, 512 }
   0x5   :  { %p579_p0 = scmp.ne.s32.totalorder %s925_s1, %s578_s11  ;;  %p582_p1 = scmp.lt.u32.totalorder %s578_s11, %s925_s1 }
   0x7   :  { %p584_p2 = pnand %p582_p1, %p579_p0 }
   0x9   :  { %587 = shalt.err (!%p584_p2)
}
   0xa   :  { %s588_s16 = scalar_lea.vmem %s36_s28, 512  ;;  %p593_p4 = scmp.lt.s32.totalorder %s36_s28, %s36_s28 }
   0xb   :  { %p589_p3 = scmp.ne.s32.totalorder %s36_s28, %s588_s16  ;;  %p594_p5 = scmp.lt.s32.totalorder %s588_s16, %s588_s16 }
   0xd   :  { %p595_p6 = por %p594_p5, %p593_p4 }
   0xf   :  { %p596_p7 = pnand %p595_p6, %p589_p3 }
  0x11   :  { %599 = shalt.err (!%p596_p7)
}
  0x12   :  { %s674_s17 = smov 128   ;;  %s675_s18 = smov 8  }
  0x13   :  { %41 = dma.hbm_to_vmem [thread:$0]  %s925_s1, 512, %s36_s28, [#allocation6], %s674_s17, %s674_s17, %s675_s18  }
  0x14   :  { %s600_s23 = scalar_lea.hbm %s924_s0, 512 }
  0x15   :  { %p601_p8 = scmp.ne.s32.totalorder %s924_s0, %s600_s23  ;;  %p604_p9 = scmp.lt.u32.totalorder %s600_s23, %s924_s0 }
  0x17   :  { %p606_p10 = pnand %p604_p9, %p601_p8 }
  0x19   :  { %609 = shalt.err (!%p606_p10)
}
  0x1a   :  { %s610_s29 = scalar_lea.vmem %s726_s30, 512  ;;  %p615_p12 = scmp.lt.s32.totalorder %s726_s30, %s726_s30 }
  0x1b   :  { %p611_p11 = scmp.ne.s32.totalorder %s726_s30, %s610_s29  ;;  %p616_p13 = scmp.lt.s32.totalorder %s610_s29, %s610_s29 }
  0x1d   :  { %p617_p0 = por %p616_p13, %p615_p12 }
  0x1f   :  { %p618_p1 = pnand %p617_p0, %p611_p11 }
  0x21   :  { %621 = shalt.err (!%p618_p1)
}
  0x22   :  { %29 = dma.hbm_to_vmem [thread:$0]  %s924_s0, 512, %s726_s30, [#allocation4], %s674_s17, %s674_s17, %s675_s18  }
  0x23   :  { %s676_s9 = smov [#allocation7]   ;;  %s677_s11 = smov [#allocation8]  }
  0x24   :  { %s47_s10 = sshll.u32 %s676_s9, 4  ;;  %s59_s12 = sshll.u32 %s677_s11, 4  ;;  %s48_s10 = int_to_ptr.vmem [resolvable:$true] %s47_s10  ;;  %s763_s12 = int_to_ptr.vmem [resolvable:$true] %s59_s12 }
  0x25   :  { %s622_s15 = scalar_lea.hbm %s926_s2, 512 }
  0x26   :  { %p623_p2 = scmp.ne.s32.totalorder %s926_s2, %s622_s15  ;;  %p626_p3 = scmp.lt.u32.totalorder %s622_s15, %s926_s2 }
  0x28   :  { %p628_p4 = pnand %p626_p3, %p623_p2 }
  0x2a   :  { %631 = shalt.err (!%p628_p4)
}
  0x2b   :  { %s632_s0 = scalar_lea.vmem %s48_s10, 512  ;;  %p637_p6 = scmp.lt.s32.totalorder %s48_s10, %s48_s10 }
  0x2c   :  { %p633_p5 = scmp.ne.s32.totalorder %s48_s10, %s632_s0  ;;  %p638_p7 = scmp.lt.s32.totalorder %s632_s0, %s632_s0 }
  0x2e   :  { %p639_p8 = por %p638_p7, %p637_p6 }
  0x30   :  { %p640_p9 = pnand %p639_p8, %p633_p5 }
  0x32   :  { %643 = shalt.err (!%p640_p9)
}
  0x33   :  { %53 = dma.hbm_to_vmem [thread:$0]  %s926_s2, 512, %s48_s10, [#allocation6], %s674_s17, %s674_s17, %s675_s18  }
  0x34   :  { %s644_s25 = scalar_lea.hbm %s927_s3, 768 }
  0x35   :  { %p645_p10 = scmp.ne.s32.totalorder %s927_s3, %s644_s25  ;;  %p648_p11 = scmp.lt.u32.totalorder %s644_s25, %s927_s3 }
  0x37   :  { %p650_p12 = pnand %p648_p11, %p645_p10 }
  0x39   :  { %653 = shalt.err (!%p650_p12)
}
  0x3a   :  { %s654_s28 = scalar_lea.vmem %s763_s12, 768  ;;  %p659_p0 = scmp.lt.s32.totalorder %s763_s12, %s763_s12 }
  0x3b   :  { %p655_p13 = scmp.ne.s32.totalorder %s763_s12, %s654_s28  ;;  %p660_p1 = scmp.lt.s32.totalorder %s654_s28, %s654_s28 }
  0x3d   :  { %p661_p2 = por %p660_p1, %p659_p0 }
  0x3f   :  { %p662_p3 = pnand %p661_p2, %p655_p13 }
  0x41   :  { %665 = shalt.err (!%p662_p3)
}
  0x42   :  { %65 = dma.hbm_to_vmem [thread:$0]  %s927_s3, 768, %s763_s12, [#allocation9], %s674_s17, %s674_s17, %s675_s18  }
  0x43   :  { %666 = dma.done.wait [#allocation4], 512  }
  0x44   :  { %667 = vsyncadd [#allocation4], 4294966784 }
  0x45   :  { %668 = dma.done.wait [#allocation6], 1024  }
  0x46   :  { %669 = vsyncadd [#allocation6], 4294966272 }
  0x47   :  { %670 = dma.done.wait [#allocation9], 768  }
  0x48   :  { %671 = vsyncadd [#allocation9], 4294966528  ;;  %v86_v0 = vlaneseq  ;;  %v678_v2 = vmov 0   ;;  %vm135_vm0 = vcmask 261120   ;;  %vm237_vm1 = vcmask 392192   ;;  %v131_v10 = vld [vmem:[#allocation3] sm:$0xff] }
  0x49   :  { %572 = vset.pattern.permute.xlu0 %v678_v2  ;;  %573 = vset.pattern.permute.xlu1 %v678_v2  ;;  %v820_v8 = vld [vmem:[%s929_s5] ss:$0 sm:$0xff]  ;;  %v679_v12 = vmov 1.0|1.0   ;;  %v386_v15 = vld [vmem:[#allocation8 + $0x8] sm:$0xff]  ;;  %v133_v18 = vld [vmem:[#allocation3 + $0x10] sm:$0xff] }
  0x4a   :  { %v800_v1 = vshrl.u32 %v86_v0, 7  ;;  %v825_v9 = vld [vmem:[%s928_s4] ss:$0 sm:$0xff]  ;;  %519 = vmatprep.mubr.msk.f32.mxu0 %vm135_vm0, %v131_v10  ;;  %v349_v16 = vld [vmem:[#allocation7 + $0x8] sm:$0xff]  ;;  %v387_v19 = vld [vmem:[#allocation8 + $0x10] sm:$0xff]  ;;  %v680_v30 = vmov 0.0  }
  0x4b   :  { %v233_v11 = vld [vmem:[#allocation5] sm:$0xff]  ;;  %v132_v17 = vld [vmem:[#allocation3 + $0x8] sm:$0xff]  ;;  %v350_v21 = vld [vmem:[#allocation7 + $0x10] sm:$0xff] }
  0x4c   :  { %v803_v3 = vadd.s32 8, %v800_v1  ;;  %v806_v4 = vadd.s32 16, %v800_v1  ;;  %v809_v5 = vadd.s32 24, %v800_v1  ;;  %v812_v6 = vadd.s32 32, %v800_v1  ;;  %537 = vmatprep.mubr.msk.f32.mxu1 %vm237_vm1, %v233_v11  ;;  %v385_v13 = vld [vmem:[#allocation8] sm:$0xff]  ;;  %v234_v20 = vld [vmem:[#allocation5 + $0x8] sm:$0xff] }
  0x4d   :  { %v815_v7 = vadd.s32 40, %v800_v1  ;;  %vm113_vm2 = vcmp.eq.s32.totalorder %v800_v1, %v820_v8  ;;  %vm95_vm4 = vcmp.eq.s32.totalorder %v800_v1, %v825_v9  ;;  %v348_v14 = vld [vmem:[#allocation7] sm:$0xff]  ;;  %393 = vperm.xlu0 %572, %v385_v13   ;;  %v134_v22 = vld [vmem:[#allocation3 + $0x18] sm:$0xff]  ;;  %v235_v23 = vld [vmem:[#allocation5 + $0x10] sm:$0xff] }
  0x4e   :  { %vm114_vm3 = vcmp.eq.s32.totalorder %v803_v3, %v820_v8  ;;  %vm96_vm5 = vcmp.eq.s32.totalorder %v803_v3, %v825_v9  ;;  %vm115_vm7 = vcmp.eq.s32.totalorder %v806_v4, %v820_v8  ;;  %vm116_vm8 = vcmp.eq.s32.totalorder %v809_v5, %v820_v8  ;;  %354 = vperm.xlu1 %573, %v348_v14   ;;  %v388_v24 = vld [vmem:[#allocation8 + $0x18] sm:$0xff]  ;;  %v389_v27 = vld [vmem:[#allocation8 + $0x20] sm:$0xff]  ;;  %v390_v28 = vld [vmem:[#allocation8 + $0x28] sm:$0xff] }
  0x4f   :  { %vm551_vm6 = vmpackc.low %vm114_vm3, %vm113_vm2  ;;  %vm97_vm9 = vcmp.eq.s32.totalorder %v806_v4, %v825_v9  ;;  %vm98_vm10 = vcmp.eq.s32.totalorder %v809_v5, %v825_v9  ;;  %vm117_vm12 = vcmp.eq.s32.totalorder %v812_v6, %v820_v8  ;;  %vm118_vm13 = vcmp.eq.s32.totalorder %v815_v7, %v820_v8  ;;  %v236_v25 = vld [vmem:[#allocation5 + $0x18] sm:$0xff] }
  0x50   :  { %552 = vmatprep.subr.msk.bf16.mxu1 %vm551_vm6, %v679_v12  ;;  %vm543_vm11 = vmpackc.low %vm96_vm5, %vm95_vm4  ;;  %v351_v26 = vld [vmem:[#allocation7 + $0x18] sm:$0xff]  ;;  %v468_v31 = vsel %vm113_vm2, 1.0, %v680_v30  ;;  %v463_v33 = vsel %vm95_vm4, 1.0, %v680_v30  ;;  %v469_v34 = vsel %vm114_vm3, 1.0, %v680_v30  ;;  %v464_v36 = vsel %vm96_vm5, 1.0, %v680_v30 }
  0x51   :  { %554 = vmatpush3.bf16.msk.msra.mxu1 %vm551_vm6, %v679_v12  ;;  %544 = vmatprep.subr.msk.bf16.mxu0 %vm543_vm11, %v679_v12  ;;  %vm555_vm14 = vmpackc.low %vm116_vm8, %vm115_vm7  ;;  %v470_v42 = vsel %vm115_vm7, 1.0, %v680_v30  ;;  %v465_v44 = vsel %vm97_vm9, 1.0, %v680_v30  ;;  %v471_v50 = vsel %vm116_vm8, 1.0, %v680_v30  ;;  %v466_v52 = vsel %vm98_vm10, 1.0, %v680_v30 }
  0x52   :  { %546 = vmatpush3.bf16.msk.msra.mxu0 %vm543_vm11, %v679_v12  ;;  %556 = vmatprep.subr.msk.bf16.mxu1 %vm555_vm14, %v679_v12  ;;  %vm547_vm15 = vmpackc.low %vm98_vm10, %vm97_vm9  ;;  %v472_v58 = vsel %vm117_vm12, 1.0, %v680_v30  ;;  %v473_v60 = vsel %vm118_vm13, 1.0, %v680_v30 }
  0x53   :  { %548 = vmatprep.subr.msk.bf16.mxu0 %vm547_vm15, %v679_v12  ;;  %vm559_vm6 = vmpackc.low %vm118_vm13, %vm117_vm12  ;;  %398 = vperm.xlu0 %572, %v386_v15  }
  0x54   :  { %359 = vperm.xlu1 %573, %v349_v16  }
  0x55   :  { %558 = vmatpush3.bf16.msk.msra.mxu1 %vm555_vm14, %v679_v12 }
  0x56   :  { %550 = vmatpush3.bf16.msk.msra.mxu0 %vm547_vm15, %v679_v12  ;;  %560 = vmatprep.subr.msk.bf16.mxu1 %vm559_vm6, %v679_v12 }
  0x57   :  { %403 = vperm.xlu0 %572, %v387_v19  }
  0x58   :  { %364 = vperm.xlu1 %573, %v350_v21  }
  0x59   :  { %562 = vmatpush3.bf16.msk.msra.mxu1 %vm559_vm6, %v679_v12  ;;  %520 = vmatmul.mubr.msk.f32.vlgmr.msra.gmra.mrb[0].mxu0 %vm135_vm0, %v132_v17 }
  0x5a   :  { %522 = vmatprep.mubr.msk.f32.mxu0 %vm135_vm0, %v133_v18 }
  0x5b   :  { %408 = vperm.xlu0 %572, %v388_v24  }
  0x5c   :  { %538 = vmatmul.mubr.msk.f32.vlgmr.msra.gmra.mrb[0].mxu1 %vm237_vm1, %v234_v20  ;;  %369 = vperm.xlu1 %573, %v351_v26  }
  0x5d   :  { %523 = vmatmul.mubr.msk.f32.gmra.mrb[2].mxu0 %vm135_vm0, %v134_v22  ;;  %540 = vmatprep.mubr.msk.f32.mxu1 %vm237_vm1, %v235_v23 }
  0x5f   :  { %413 = vperm.xlu0 %572, %v389_v27  }
  0x60   :  { %541 = vmatmul.mubr.msk.f32.gmra.mrb[2].mxu1 %vm237_vm1, %v236_v25  ;;  %418 = vperm.xlu1 %573, %v390_v28  }
  0xcc   :  { %v394_v29 = vpop.permute.xlu0 %393 }
  0xcd   :  { %v355_v32 = vpop.permute.xlu1 %354  ;;  %v421_v35 = vmul.f32 %v468_v31, %v394_v29 }
  0xce   :  { %v372_v37 = vmul.f32 %v463_v33, %v355_v32 }
  0xd2   :  { %v399_v38 = vpop.permute.xlu0 %398 }
  0xd3   :  { %v422_v39 = vmul.f32 %v469_v34, %v399_v38  ;;  %v360_v40 = vpop.permute.xlu1 %359  ;;  %v441_v38 = vstv %s930_s6 }
  0xd4   :  { %v373_v41 = vmul.f32 %v464_v36, %v360_v40 }
  0xd5   :  { %v427_v43 = vadd.f32 %v422_v39, %v421_v35 }
  0xd6   :  { %v376_v45 = vadd.f32 %v373_v41, %v372_v37  ;;  %v404_v46 = vpop.permute.xlu0 %403 }
  0xd7   :  { %v423_v47 = vmul.f32 %v470_v42, %v404_v46  ;;  %v365_v48 = vpop.permute.xlu1 %364 }
  0xd8   :  { %v374_v49 = vmul.f32 %v465_v44, %v365_v48 }
  0xd9   :  { %v428_v51 = vadd.f32 %v427_v43, %v423_v47 }
  0xda   :  { %v377_v53 = vadd.f32 %v376_v45, %v374_v49  ;;  %v409_v54 = vpop.permute.xlu0 %408 }
  0xdb   :  { %v424_v55 = vmul.f32 %v471_v50, %v409_v54  ;;  %v370_v56 = vpop.permute.xlu1 %369 }
  0xdc   :  { %v375_v57 = vmul.f32 %v466_v52, %v370_v56 }
  0xdd   :  { %v429_v59 = vadd.f32 %v428_v51, %v424_v55 }
  0xde   :  { %v378_v61 = vadd.f32 %v377_v53, %v375_v57  ;;  %v414_v62 = vpop.permute.xlu0 %413 }
  0xdf   :  { %v425_v63 = vmul.f32 %v472_v58, %v414_v62  ;;  %v419_v0 = vpop.permute.xlu1 %418 }
  0xe0   :  { %v426_v1 = vmul.f32 %v473_v60, %v419_v0  ;;  %v379_v6 = vrot.slane %v378_v61, 4 }
  0xe1   :  { %v430_v2 = vadd.f32 %v429_v59, %v425_v63 }
  0xe2   :  { %v380_v18 = vadd.f32 %v379_v6, %v378_v61 }
  0xe3   :  { %v431_v3 = vadd.f32 %v430_v2, %v426_v1 }
  0xe4   :  { %v381_v22 = vrot.slane %v380_v18, 2 }
  0xe5   :  { %v432_v15 = vrot.slane %v431_v3, 4 }
  0xe6   :  { %v382_v26 = vadd.f32 %v381_v22, %v380_v18 }
  0xe7   :  { %v433_v20 = vadd.f32 %v432_v15, %v431_v3 }
  0xe8   :  { %v383_v30 = vrot.slane %v382_v26, 1 }
  0xe9   :  { %v434_v24 = vrot.slane %v433_v20, 2 }
  0xea   :  { %v384_v34 = vadd.f32 %v383_v30, %v382_v26 }
  0xeb   :  { %v435_v28 = vadd.f32 %v434_v24, %v433_v20 }
  0xed   :  { %v436_v32 = vrot.slane %v435_v28, 1 }
  0xef   :  { %v437_v36 = vadd.f32 %v436_v32, %v435_v28 }
 0x12c   :  { %v521_v4 = vpop.f32.mrb[0].mxu0 }
 0x12d   :  { %v214_v5 = vpop.f32.mrb[1].mxu0 }
 0x12f   :  { %v539_v9 = vpop.f32.mrb[0].mxu1 }
 0x130   :  { %v336_v10 = vmul.f32 %v539_v9, %v521_v4  ;;  %v316_v11 = vpop.f32.mrb[1].mxu1  ;;  %v524_v12 = vpop.f32.mrb[2].mxu0 }
 0x131   :  { %v335_v13 = vmul.f32 %v316_v11, %v214_v5  ;;  %v224_v14 = vpop.f32.mrb[3].mxu0 }
 0x133   :  { %v339_v16 = vadd.f32 %v336_v10, %v335_v13  ;;  %v542_v7 = vpop.f32.mrb[2].mxu1 }
 0x134   :  { %v338_v8 = vmul.f32 %v542_v7, %v524_v12  ;;  %v326_v17 = vpop.f32.mrb[3].mxu1 }
 0x135   :  { %v337_v19 = vmul.f32 %v326_v17, %v224_v14 }
 0x137   :  { %v340_v21 = vadd.f32 %v339_v16, %v337_v19 }
 0x139   :  { %v341_v23 = vadd.f32 %v340_v21, %v338_v8 }
 0x13b   :  { %v342_v25 = vrot.slane %v341_v23, 4 }
 0x13d   :  { %v343_v27 = vadd.f32 %v342_v25, %v341_v23 }
 0x13f   :  { %v344_v29 = vrot.slane %v343_v27, 2 }
 0x141   :  { %v345_v31 = vadd.f32 %v344_v29, %v343_v27 }
 0x143   :  { %v346_v33 = vrot.slane %v345_v31, 1 }
 0x145   :  { %v347_v35 = vadd.f32 %v346_v33, %v345_v31 }
 0x147   :  { %v438_v37 = vadd.f32 %v384_v34, %v347_v35 }
 0x149   :  { %v439_v39 = vadd.f32 %v438_v37, %v437_v36 }
 0x14b   :  { %v442_v40 = vadd.f32 %v441_v38, %v439_v39 }
 0x14d   :  { %443 = vst [vmem:[%s931_s7] sm:$0x1] %v442_v40  ;;  %v492_v41 = vmul.f32 -1.442695, %v442_v40 }
 0x14f   :  { %574 = vpow2.f32 %v492_v41 }
 0x159   :  { %v575_v42 = vpop.eup %574 }
 0x15a   :  { %v447_v43 = vadd.f32 1.0, %v575_v42 }
 0x15c   :  { %576 = vrcp.f32 %v447_v43 }
 0x166   :  { %v577_v44 = vpop.eup %576 }
 0x167   :  { %450 = vst [vmem:[%s932_s8] sm:$0x1] %v577_v44 }
 0x168   :  { %459 = vsyncpa [#allocation4], 1 }
 0x169   :  { %460 = vsyncpa [#allocation6], 1 }
 0x16a   :  { %461 = vsyncpa [#allocation9], 1 }

</bundles_post_ra>
